<compile_context>
chip_gen: v5e
topology: v5e:2x2
jax: 0.10.0
libtpu: 0.0.40
codegen_flags: <defaults>
</compile_context>

<pallas_src>
import functools

import jax
import jax.numpy as jnp
from jax.experimental import pallas as pl
from jax.experimental.pallas import tpu as pltpu


def _round_up(x, m):
    return (x + m - 1) // m * m


def _cdiv(a, b):
    return -(-a // b)


def qnetwork_kernel(s_ref, w1_ref, b1_ref, w2_ref, b2_ref, wh_ref, bh_ref,
                    q_ref, *, action_size):
    # Cast the f32 state to bf16 in vregs (free; avoids a wrapper-side HBM pass).
    x = s_ref[...].astype(jnp.bfloat16)
    # fc1 + relu  (bf16 matmul, f32 accumulate / bias / relu)
    x = jnp.dot(x, w1_ref[...], preferred_element_type=jnp.float32)
    x = jnp.maximum(x + b1_ref[...], 0.0).astype(jnp.bfloat16)
    # fc2 + relu
    x = jnp.dot(x, w2_ref[...], preferred_element_type=jnp.float32)
    x = jnp.maximum(x + b2_ref[...], 0.0).astype(jnp.bfloat16)
    # fused heads: columns [0, A) = advantage, column A = value, rest exact 0
    y = jnp.dot(x, wh_ref[...], preferred_element_type=jnp.float32) + bh_ref[...]
    v = y[:, action_size:action_size + 1]                    # (tb, 1) value
    adv = y[:, :action_size]                                 # (tb, A) advantage
    adv_mean = (jnp.sum(y, axis=-1, keepdims=True) - v) * (1.0 / action_size)
    # Q = V - (A - mean(A)); store only the meaningful action_size columns.
    q_ref[...] = (v - adv + adv_mean).astype(q_ref.dtype)


def qnetwork_forward(state, packed_params, *, action_size, tile_b=2048):
    w1, b1, w2, b2, wh, bh = packed_params
    B, S = state.shape
    F1P, F2P, NP = w1.shape[1], w2.shape[1], wh.shape[1]

    # Derive the batch tile from B: <8 padded rows per step, multiple of 8
    # sublanes, even grid (when >1 step) so the "parallel" axis splits evenly
    # across v7x's two TensorCores.
    num_steps = max(1, _cdiv(B, max(8, int(tile_b))))
    if num_steps > 1 and num_steps % 2 == 1:
        num_steps += 1
    tb = _round_up(_cdiv(B, num_steps), 8)
    b_pad = num_steps * tb

    x = state
    if b_pad != B:                       # ragged batch: zero-pad a few rows
        x = jnp.pad(x, ((0, b_pad - B), (0, 0)))

    const = lambda shape: pl.BlockSpec(shape, lambda i: (0, 0))
    kernel = functools.partial(qnetwork_kernel, action_size=action_size)

    flops = 2 * b_pad * (S * F1P + F1P * F2P + F2P * NP)
    bytes_accessed = (
        x.size * x.dtype.itemsize
        + sum(a.size * a.dtype.itemsize for a in packed_params)
        + b_pad * action_size * 4)

    q = pl.pallas_call(
        kernel,
        out_shape=jax.ShapeDtypeStruct((b_pad, action_size), jnp.float32),
        grid_spec=pl.GridSpec(
            grid=(num_steps,),
            in_specs=[
                pl.BlockSpec((tb, S), lambda i: (i, 0)),   # state tile (pipelined)
                const(w1.shape), const(b1.shape),          # weights stay resident
                const(w2.shape), const(b2.shape),
                const(wh.shape), const(bh.shape),
            ],
            # Narrow output block: last dim == full array dim (action_size).
            out_specs=pl.BlockSpec((tb, action_size), lambda i: (i, 0)),
        ),
        compiler_params=pltpu.CompilerParams(
            dimension_semantics=("parallel",),             # shard batch over TCs
        ),
        cost_estimate=pl.CostEstimate(
            flops=flops, transcendentals=0, bytes_accessed=bytes_accessed),
    )(x, w1, b1, w2, b2, wh, bh)
    return q[:B] if b_pad != B else q


def init_params(key, state_size, action_size, fc1_units=64, fc2_units=64):
    """PyTorch-Linear-style init U(-1/sqrt(fan_in), 1/sqrt(fan_in)).
    Weights stored as (in_features, out_features); biases as (1, out_features)."""
    def linear(k, fan_in, fan_out):
        kw, kb = jax.random.split(k)
        bound = 1.0 / jnp.sqrt(fan_in)
        w = jax.random.uniform(kw, (fan_in, fan_out), jnp.float32, -bound, bound)
        b = jax.random.uniform(kb, (1, fan_out), jnp.float32, -bound, bound)
        return w, b

    k1, k2, k3, k4 = jax.random.split(key, 4)
    w1, b1 = linear(k1, state_size, fc1_units)
    w2, b2 = linear(k2, fc1_units, fc2_units)
    wv, bv = linear(k3, fc2_units, 1)
    wa, ba = linear(k4, fc2_units, action_size)
    return (w1, b1, w2, b2, wv, bv, wa, ba)


def pack_params(params, action_size):
    """Zero-pad hidden/head dims to multiples of 128 (exactly semantics
    preserving), fuse the value+advantage heads, and cast weights to bf16."""
    (w1, b1, w2, b2, wv, bv, wa, ba) = params
    S, F1 = w1.shape
    F2 = w2.shape[1]
    F1P = _round_up(F1, 128)
    F2P = _round_up(F2, 128)
    NP = _round_up(action_size + 1, 128)

    def pad2(a, rows, cols):
        return jnp.pad(a, ((0, rows - a.shape[0]), (0, cols - a.shape[1])))

    bf = jnp.bfloat16
    w1p = pad2(w1, S, F1P).astype(bf)
    b1p = pad2(b1, 1, F1P).astype(jnp.float32)
    w2p = pad2(w2, F1P, F2P).astype(bf)
    b2p = pad2(b2, 1, F2P).astype(jnp.float32)
    # fused head layout: [advantage (A cols) | value (1 col) | zero padding]
    whp = pad2(jnp.concatenate([wa, wv], axis=1), F2P, NP).astype(bf)
    bhp = pad2(jnp.concatenate([ba, bv], axis=1), 1, NP).astype(jnp.float32)
    return (w1p, b1p, w2p, b2p, whp, bhp)


def reference_forward(state, params):
    """Pure-JAX reference mirroring the PyTorch forward (matmul inputs cast to
    bf16 with f32 accumulation, matching the kernel's precision choice)."""
    (w1, b1, w2, b2, wv, bv, wa, ba) = params
    bf = jnp.bfloat16
    x = state.astype(bf)
    x = jnp.maximum(jnp.dot(x, w1.astype(bf), preferred_element_type=jnp.float32) + b1, 0.0).astype(bf)
    x = jnp.maximum(jnp.dot(x, w2.astype(bf), preferred_element_type=jnp.float32) + b2, 0.0).astype(bf)
    value = jnp.dot(x, wv.astype(bf), preferred_element_type=jnp.float32) + bv   # (B, 1)
    adv = jnp.dot(x, wa.astype(bf), preferred_element_type=jnp.float32) + ba     # (B, A)
    V_s = value.T                                    # (1, B)
    A_sa = adv.T                                     # (A, B)
    A_sa = A_sa - (1.0 / adv.shape[1]) * jnp.sum(A_sa, axis=0)
    Q = V_s - A_sa                                   # (A, B)  (same sign as PyTorch spec)
    return Q.T                                       # (B, A)


if __name__ == "__main__":
    state_size = 8
    action_size = 4

    key = jax.random.PRNGKey(0)
    k_params, k_state1, k_state2 = jax.random.split(key, 3)
    params = init_params(k_params, state_size, action_size, fc1_units=64, fc2_units=64)
    packed = pack_params(params, action_size)

    # Case 1: tiny batch (single grid step).
    state1 = jax.random.normal(k_state1, (2, state_size), jnp.float32)
    q1 = qnetwork_forward(state1, packed, action_size=action_size)
    jax.block_until_ready(q1)
    ref1 = reference_forward(state1, params)
    assert q1.shape == (2, action_size)
    assert jnp.allclose(q1, ref1, atol=1e-3, rtol=1e-3), "mismatch vs reference (batch=2)"

    # Case 2: ragged batch with a small tile -> multi-step pipelined grid + padding.
    state2 = jax.random.normal(k_state2, (50, state_size), jnp.float32)
    q2 = qnetwork_forward(state2, packed, action_size=action_size, tile_b=16)
    jax.block_until_ready(q2)
    ref2 = reference_forward(state2, params)
    assert q2.shape == (50, action_size)
    assert jnp.allclose(q2, ref2, atol=1e-3, rtol=1e-3), "mismatch vs reference (batch=50)"

    print("KERNEL_OK")
</pallas_src>

<mosaic_0001>
module attributes {stable_mosaic.version = 11 : i64} {
  func.func @qnetwork_kernel(%arg0: i32, %arg1: memref<8x8xf32, #tpu.memory_space<vmem>>, %arg2: memref<8x128xbf16, #tpu.memory_space<vmem>>, %arg3: memref<1x128xf32, #tpu.memory_space<vmem>>, %arg4: memref<128x128xbf16, #tpu.memory_space<vmem>>, %arg5: memref<1x128xf32, #tpu.memory_space<vmem>>, %arg6: memref<128x128xbf16, #tpu.memory_space<vmem>>, %arg7: memref<1x128xf32, #tpu.memory_space<vmem>>, %arg8: memref<8x4xf32, #tpu.memory_space<vmem>>) attributes {dimension_semantics = [#tpu.dimension_semantics<parallel>], iteration_bounds = array<i64: 1>, scalar_prefetch = 0 : i64, scratch_operands = 0 : i64, tpu.core_type = #tpu.core_type<tc>, window_params = [{transform_indices = @transform_0, window_bounds = array<i64: 8, 8>}, {pipeline_mode = #tpu.pipeline_mode<synchronous>, transform_indices = @transform_1, window_bounds = array<i64: 8, 128>}, {pipeline_mode = #tpu.pipeline_mode<synchronous>, transform_indices = @transform_2, window_bounds = array<i64: 1, 128>}, {pipeline_mode = #tpu.pipeline_mode<synchronous>, transform_indices = @transform_3, window_bounds = array<i64: 128, 128>}, {pipeline_mode = #tpu.pipeline_mode<synchronous>, transform_indices = @transform_4, window_bounds = array<i64: 1, 128>}, {pipeline_mode = #tpu.pipeline_mode<synchronous>, transform_indices = @transform_5, window_bounds = array<i64: 128, 128>}, {pipeline_mode = #tpu.pipeline_mode<synchronous>, transform_indices = @transform_6, window_bounds = array<i64: 1, 128>}, {transform_indices = @transform_7, window_bounds = array<i64: 8, 4>}]} {
    %c0 = arith.constant 0 : index
    %c0_0 = arith.constant 0 : index
    %0 = vector.load %arg1[%c0, %c0_0] : memref<8x8xf32, #tpu.memory_space<vmem>>, vector<8x8xf32>
    %1 = arith.truncf %0 : vector<8x8xf32> to vector<8x8xbf16>
    %c0_1 = arith.constant 0 : index
    %c0_2 = arith.constant 0 : index
    %2 = vector.load %arg2[%c0_1, %c0_2] : memref<8x128xbf16, #tpu.memory_space<vmem>>, vector<8x128xbf16>
    %cst = arith.constant dense<0.000000e+00> : vector<8x128xf32>
    %3 = tpu.matmul %1, %2, %cst {dimension_numbers = #tpu.dot_dimension_numbers<[1], [0], [0], [1], [0, 0, 1, 1], [], []>} : vector<8x8xbf16>, vector<8x128xbf16>, vector<8x128xf32> -> vector<8x128xf32>
    %c0_3 = arith.constant 0 : index
    %c0_4 = arith.constant 0 : index
    %4 = vector.load %arg3[%c0_3, %c0_4] : memref<1x128xf32, #tpu.memory_space<vmem>>, vector<1x128xf32>
    %5 = vector.broadcast %4 : vector<1x128xf32> to vector<8x128xf32>
    %6 = arith.addf %3, %5 : vector<8x128xf32>
    %cst_5 = arith.constant 0.000000e+00 : f32
    %7 = vector.broadcast %cst_5 : f32 to vector<8x128xf32>
    %8 = arith.maximumf %6, %7 : vector<8x128xf32>
    %9 = arith.truncf %8 : vector<8x128xf32> to vector<8x128xbf16>
    %c0_6 = arith.constant 0 : index
    %c0_7 = arith.constant 0 : index
    %10 = vector.load %arg4[%c0_6, %c0_7] : memref<128x128xbf16, #tpu.memory_space<vmem>>, vector<128x128xbf16>
    %cst_8 = arith.constant dense<0.000000e+00> : vector<8x128xf32>
    %11 = tpu.matmul %9, %10, %cst_8 {dimension_numbers = #tpu.dot_dimension_numbers<[1], [0], [0], [1], [0, 0, 1, 1], [], []>} : vector<8x128xbf16>, vector<128x128xbf16>, vector<8x128xf32> -> vector<8x128xf32>
    %c0_9 = arith.constant 0 : index
    %c0_10 = arith.constant 0 : index
    %12 = vector.load %arg5[%c0_9, %c0_10] : memref<1x128xf32, #tpu.memory_space<vmem>>, vector<1x128xf32>
    %13 = vector.broadcast %12 : vector<1x128xf32> to vector<8x128xf32>
    %14 = arith.addf %11, %13 : vector<8x128xf32>
    %cst_11 = arith.constant 0.000000e+00 : f32
    %15 = vector.broadcast %cst_11 : f32 to vector<8x128xf32>
    %16 = arith.maximumf %14, %15 : vector<8x128xf32>
    %17 = arith.truncf %16 : vector<8x128xf32> to vector<8x128xbf16>
    %c0_12 = arith.constant 0 : index
    %c0_13 = arith.constant 0 : index
    %18 = vector.load %arg6[%c0_12, %c0_13] : memref<128x128xbf16, #tpu.memory_space<vmem>>, vector<128x128xbf16>
    %cst_14 = arith.constant dense<0.000000e+00> : vector<8x128xf32>
    %19 = tpu.matmul %17, %18, %cst_14 {dimension_numbers = #tpu.dot_dimension_numbers<[1], [0], [0], [1], [0, 0, 1, 1], [], []>} : vector<8x128xbf16>, vector<128x128xbf16>, vector<8x128xf32> -> vector<8x128xf32>
    %c0_15 = arith.constant 0 : index
    %c0_16 = arith.constant 0 : index
    %20 = vector.load %arg7[%c0_15, %c0_16] : memref<1x128xf32, #tpu.memory_space<vmem>>, vector<1x128xf32>
    %21 = vector.broadcast %20 : vector<1x128xf32> to vector<8x128xf32>
    %22 = arith.addf %19, %21 : vector<8x128xf32>
    %23 = vector.extract_strided_slice %22 {offsets = [0, 4], sizes = [8, 1], strides = [1, 1]} : vector<8x128xf32> to vector<8x1xf32>
    %24 = vector.extract_strided_slice %22 {offsets = [0, 0], sizes = [8, 4], strides = [1, 1]} : vector<8x128xf32> to vector<8x4xf32>
    %cst_17 = arith.constant dense<0.000000e+00> : vector<8xf32>
    %25 = vector.multi_reduction <add>, %22, %cst_17 [1] : vector<8x128xf32> to vector<8xf32>
    %26 = vector.shape_cast %25 : vector<8xf32> to vector<8x1xf32>
    %27 = arith.subf %26, %23 : vector<8x1xf32>
    %cst_18 = arith.constant 2.500000e-01 : f32
    %28 = vector.broadcast %cst_18 : f32 to vector<8x1xf32>
    %29 = arith.mulf %27, %28 : vector<8x1xf32>
    %30 = vector.broadcast %23 : vector<8x1xf32> to vector<8x4xf32>
    %31 = arith.subf %30, %24 : vector<8x4xf32>
    %32 = vector.broadcast %29 : vector<8x1xf32> to vector<8x4xf32>
    %33 = arith.addf %31, %32 : vector<8x4xf32>
    %c0_19 = arith.constant 0 : index
    %c0_20 = arith.constant 0 : index
    %34 = vector.load %arg8[%c0_19, %c0_20] : memref<8x4xf32, #tpu.memory_space<vmem>>, vector<8x4xf32>
    tpu.vector_store %arg8[%c0_19, %c0_20], %33 {strides = array<i32>} : memref<8x4xf32, #tpu.memory_space<vmem>>, vector<8x4xf32>,
    return
  }
  func.func @transform_0(%arg0: i32) -> (i32, i32) {
    %c0_i32 = arith.constant 0 : i32
    %c0_i32_0 = arith.constant 0 : i32
    return %arg0, %c0_i32 : i32, i32
  }
  func.func @transform_1(%arg0: i32) -> (i32, i32) {
    %c0_i32 = arith.constant 0 : i32
    %c0_i32_0 = arith.constant 0 : i32
    %c0_i32_1 = arith.constant 0 : i32
    return %c0_i32, %c0_i32_0 : i32, i32
  }
  func.func @transform_2(%arg0: i32) -> (i32, i32) {
    %c0_i32 = arith.constant 0 : i32
    %c0_i32_0 = arith.constant 0 : i32
    %c0_i32_1 = arith.constant 0 : i32
    return %c0_i32, %c0_i32_0 : i32, i32
  }
  func.func @transform_3(%arg0: i32) -> (i32, i32) {
    %c0_i32 = arith.constant 0 : i32
    %c0_i32_0 = arith.constant 0 : i32
    %c0_i32_1 = arith.constant 0 : i32
    return %c0_i32, %c0_i32_0 : i32, i32
  }
  func.func @transform_4(%arg0: i32) -> (i32, i32) {
    %c0_i32 = arith.constant 0 : i32
    %c0_i32_0 = arith.constant 0 : i32
    %c0_i32_1 = arith.constant 0 : i32
    return %c0_i32, %c0_i32_0 : i32, i32
  }
  func.func @transform_5(%arg0: i32) -> (i32, i32) {
    %c0_i32 = arith.constant 0 : i32
    %c0_i32_0 = arith.constant 0 : i32
    %c0_i32_1 = arith.constant 0 : i32
    return %c0_i32, %c0_i32_0 : i32, i32
  }
  func.func @transform_6(%arg0: i32) -> (i32, i32) {
    %c0_i32 = arith.constant 0 : i32
    %c0_i32_0 = arith.constant 0 : i32
    %c0_i32_1 = arith.constant 0 : i32
    return %c0_i32, %c0_i32_0 : i32, i32
  }
  func.func @transform_7(%arg0: i32) -> (i32, i32) {
    %c0_i32 = arith.constant 0 : i32
    %c0_i32_0 = arith.constant 0 : i32
    return %arg0, %c0_i32 : i32, i32
  }
}

</mosaic_0001>

<bundles_post_ra>
// kernel: tpu_custom_call.1
= control target key start
LH: loop header
LB: loop body
LE: loop exit
PB: predicated region body
PF: predicated region fallthrough
CT: control target
= control target key end

     0   :  { %12 = vsyncpa [#allocation3], 0  ;;  %s571_s0 = inlined_call_operand.hbm [shape: f32[8,8], index: 0, kind: input, shape index: {}]   ;;  %s572_s1 = inlined_call_operand.hbm [shape: bf16[8,128], index: 1, kind: input, shape index: {}]   ;;  %s573_s2 = inlined_call_operand.vmem [shape: f32[1,128], index: 2, kind: input, shape index: {}]   ;;  %s574_s3 = inlined_call_operand.hbm [shape: bf16[128,128], index: 3, kind: input, shape index: {}]   ;;  %s575_s4 = inlined_call_operand.vmem [shape: f32[1,128], index: 4, kind: input, shape index: {}]   ;;  %s576_s5 = inlined_call_operand.hbm [shape: bf16[128,128], index: 5, kind: input, shape index: {}]   ;;  %s577_s6 = inlined_call_operand.vmem [shape: f32[1,128], index: 6, kind: input, shape index: {}]   ;;  %s578_s7 = inlined_call_operand.vmem [shape: f32[8,4], index: 7, kind: output, shape index: {}]  }
   0x1   :  { %13 = vsyncpa [#allocation5], 0  ;;  %s31_s26 = sshll.u32 %s572_s1, 4  ;;  %s32_s26 = int_to_ptr.hbm [resolvable:$true] %s31_s26 }
   0x2   :  { %14 = vsyncpa [#allocation8], 0  ;;  %s500_s27 = smov [#allocation4]   ;;  %s20_s8 = sshll.u32 %s571_s0, 4  ;;  %s21_s8 = int_to_ptr.hbm [resolvable:$true] %s20_s8 }
   0x3   :  { %s33_s28 = sshll.u32 %s500_s27, 4  ;;  %s501_s9 = smov [#allocation2]   ;;  %s34_s28 = int_to_ptr.vmem [resolvable:$true] %s33_s28 }
   0x4   :  { %36 = dma.hbm_to_vmem [thread:$0]  %s32_s26, 64, %s34_s28, [#allocation5]  }
   0x5   :  { %s22_s10 = sshll.u32 %s501_s9, 4  ;;  %s43_s13 = sshll.u32 %s574_s3, 4  ;;  %s23_s10 = int_to_ptr.vmem [resolvable:$true] %s22_s10  ;;  %s44_s13 = int_to_ptr.hbm [resolvable:$true] %s43_s13 }
   0x6   :  { %25 = dma.hbm_to_vmem [thread:$0]  %s21_s8, 128, %s23_s10, [#allocation3]  }
   0x7   :  { %s502_s1 = smov [#allocation6]   ;;  %s58_s17 = sshll.u32 %s576_s5, 4  ;;  %s59_s17 = int_to_ptr.hbm [resolvable:$true] %s58_s17 }
   0x8   :  { %s45_s14 = sshll.u32 %s502_s1, 4  ;;  %s503_s18 = smov 64   ;;  %s46_s14 = int_to_ptr.vmem [resolvable:$true] %s45_s14 }
   0x9   :  { %s504_s0 = smov 4   ;;  %s505_s19 = smov [#allocation7]  }
   0xa   :  { %51 = dma.hbm_to_vmem [thread:$0]  %s44_s13, 1024, %s46_s14, [#allocation5], %s503_s18, %s503_s18, %s504_s0  }
   0xb   :  { %s60_s20 = sshll.u32 %s505_s19, 4  ;;  %s61_s20 = int_to_ptr.vmem [resolvable:$true] %s60_s20 }
   0xc   :  { %66 = dma.hbm_to_vmem [thread:$0]  %s59_s17, 1024, %s61_s20, [#allocation8], %s503_s18, %s503_s18, %s504_s0  }
   0xd   :  { %494 = dma.done.wait [#allocation3], 128  }
   0xe   :  { %495 = vsyncadd [#allocation3], 4294967168 }
   0xf   :  { %496 = dma.done.wait [#allocation5], 1088  }
  0x10   :  { %497 = vsyncadd [#allocation5], 4294966208 }
  0x11   :  { %498 = dma.done.wait [#allocation8], 1024  }
  0x12   :  { %499 = vsyncadd [#allocation8], 4294966272  ;;  %vm97_vm0 = vcmask 1043456   ;;  %v88_v0 = vld [vmem:[#allocation4] sm:$0xf]  ;;  %v86_v1 = vld [vmem:[#allocation2] sm:$0xff] }
  0x13   :  { %v377_v2 = vld [vmem:[#allocation6 + $0x38] sm:$0xff]  ;;  %v99_v3 = vsel %vm97_vm0, %v88_v0, 0  ;;  %v87_v4 = vpack.c.bf16 %v86_v1, %v86_v1  ;;  %vm93_vm1 = vcmask 64512   ;;  %v376_v5 = vld [vmem:[#allocation6 + $0x30] sm:$0xff]  ;;  %v375_v6 = vld [vmem:[#allocation6 + $0x28] sm:$0xff]  ;;  %v506_v32 = vmov 4  }
  0x14   :  { %108 = vmatpush.bf16.msra.mxu0 %v99_v3  ;;  %184 = vmatpush.bf16.msra.mxu1 %v377_v2  ;;  %v374_v7 = vld [vmem:[#allocation6 + $0x20] sm:$0xff]  ;;  %v373_v8 = vld [vmem:[#allocation6 + $0x18] sm:$0xff]  ;;  %v372_v9 = vld [vmem:[#allocation6 + $0x10] sm:$0xff]  ;;  %vm296_vm2 = vcmask 31744  }
  0x15   :  { %v371_v10 = vld [vmem:[#allocation6 + $0x8] sm:$0xff]  ;;  %v370_v11 = vld [vmem:[#allocation6] sm:$0xff]  ;;  %v385_v12 = vld [vmem:[#allocation7 + $0x38] sm:$0xff]  ;;  %393 = vset.pattern.permute.xlu0 %v506_v32  ;;  %394 = vset.pattern.permute.xlu1 %v506_v32 }
  0x16   :  { %267 = vmatpush.bf16.msra.mxu2 %v385_v12  ;;  %v384_v13 = vld [vmem:[#allocation7 + $0x30] sm:$0xff]  ;;  %v383_v14 = vld [vmem:[#allocation7 + $0x28] sm:$0xff]  ;;  %v382_v15 = vld [vmem:[#allocation7 + $0x20] sm:$0xff] }
  0x17   :  { %305 = vmatmul.msk.bf16.vlgmr.msra.gmra.mxu0 %vm93_vm1, %v87_v4  ;;  %v381_v16 = vld [vmem:[#allocation7 + $0x18] sm:$0xff]  ;;  %v380_v17 = vld [vmem:[#allocation7 + $0x10] sm:$0xff]  ;;  %v379_v24 = vld [vmem:[#allocation7 + $0x8] sm:$0xff] }
  0x18   :  { %185 = vmatpush.bf16.msra.mxu1 %v376_v5  ;;  %v395_v18 = vld [vmem:[%s573_s2] ss:$0 sm:$0xff]  ;;  %v378_v25 = vld [vmem:[#allocation7] sm:$0xff] }
  0x19   :  { %v396_v26 = vld [vmem:[%s575_s4] ss:$0 sm:$0xff] }
  0x1a   :  { %268 = vmatpush.bf16.msra.mxu2 %v384_v13  ;;  %v397_v33 = vld [vmem:[%s577_s6] ss:$0 sm:$0xff] }
  0x1c   :  { %186 = vmatpush.bf16.msra.mxu1 %v375_v6 }
  0x1e   :  { %269 = vmatpush.bf16.msra.mxu2 %v383_v14 }
  0x20   :  { %187 = vmatpush.bf16.msra.mxu1 %v374_v7 }
  0x22   :  { %270 = vmatpush.bf16.msra.mxu2 %v382_v15 }
  0x24   :  { %188 = vmatpush.bf16.msra.mxu1 %v373_v8 }
  0x26   :  { %271 = vmatpush.bf16.msra.mxu2 %v381_v16 }
  0x28   :  { %189 = vmatpush.bf16.msra.mxu1 %v372_v9 }
  0x2a   :  { %272 = vmatpush.bf16.msra.mxu2 %v380_v17 }
  0x2c   :  { %190 = vmatpush.bf16.msra.mxu1 %v371_v10 }
  0x2e   :  { %273 = vmatpush.bf16.msra.mxu2 %v379_v24 }
  0x30   :  { %191 = vmatpush.bf16.msra.mxu1 %v370_v11 }
  0x32   :  { %274 = vmatpush.bf16.msra.mxu2 %v378_v25 }
  0x94   :  { %v110_v19 = vpop.f32.mrf.mxu0 }
  0x95   :  { %v111_v20 = vadd.f32 %v395_v18, %v110_v19 }
  0x97   :  { %v114_v21 = vmax.f32 %v111_v20, 0.0 }
  0x99   :  { %v115_v22 = vpack.c.bf16 %v114_v21, %v114_v21 }
  0x9b   :  { %192 = vmatmul.bf16.vlgmr.msra.gmra.mxu1 %v115_v22 }
  0x9c   :  { %v112_v23 = vpop.f32.mrf.mxu0 }
 0x118   :  { %v193_v27 = vpop.f32.mrf.mxu1 }
 0x119   :  { %v194_v28 = vadd.f32 %v396_v26, %v193_v27 }
 0x11b   :  { %v197_v29 = vmax.f32 %v194_v28, 0.0 }
 0x11d   :  { %v198_v30 = vpack.c.bf16 %v197_v29, %v197_v29 }
 0x11f   :  { %275 = vmatmul.bf16.vlgmr.msra.gmra.mxu2 %v198_v30 }
 0x120   :  { %v195_v31 = vpop.f32.mrf.mxu1 }
 0x1a2   :  { %v276_v34 = vpop.f32.mrf.mxu2 }
 0x1a3   :  { %v277_v35 = vadd.f32 %v397_v33, %v276_v34 }
 0x1a5   :  { %280 = vadd.xlane.f32.xlu0 %v277_v35 }
 0x1aa   :  { %v278_v36 = vpop.f32.mrf.mxu2 }
 0x1b9   :  { %286 = vperm.xlu0 %393, %v277_v35  }
 0x218   :  { %v281_v37 = vpop.xlane.xlu0 %280 }
 0x219   :  { %v282_v38 = vsub.f32 %v281_v37, %v277_v35 }
 0x21b   :  { %v283_v39 = vmul.f32 0.25, %v282_v38 }
 0x21d   :  { %292 = vperm.xlu1 %394, %v283_v39  }
 0x22b   :  { %v287_v40 = vpop.permute.xlu0 %286 }
 0x22c   :  { %v289_v41 = vsub.f32 %v287_v40, %v277_v35 }
 0x28f   :  { %v293_v42 = vpop.permute.xlu1 %292 }
 0x290   :  { %v295_v43 = vadd.f32 %v293_v42, %v289_v41 }
 0x292   :  { %297 = vst.msk [vmem:[%s578_s7] sm:$0xff] %vm296_vm2, %v295_v43 }
 0x293   :  { %302 = vsyncpa [#allocation3], 1 }
 0x294   :  { %303 = vsyncpa [#allocation5], 1 }
 0x295   :  { %304 = vsyncpa [#allocation8], 1 }

</bundles_post_ra>
